<compile_context>
chip_gen: v6e
topology: v6e:2x2x1
jax: 0.10.0
libtpu: 0.0.40
codegen_flags: <defaults>
</compile_context>

<pallas_src>
import functools
import math

import jax
import jax.numpy as jnp
from jax import lax
from jax.experimental import pallas as pl
from jax.experimental.pallas import tpu as pltpu


def _round_up(n, m):
    return ((n + m - 1) // m) * m


def _pick_tile(n, max_tile, mult):
    """Largest multiple of `mult` that divides n and is <= max_tile (n % mult == 0)."""
    if n <= max_tile:
        return n
    t = (max_tile // mult) * mult
    while t > mult:
        if n % t == 0:
            return t
        t -= mult
    return mult


def _fused_attn_kernel(x_ref, wq_ref, wk_ref, o_ref, k_ref, *, scale, tq, cdt):
    """out[b, qi-tile] = ((x_tile @ Wq) * scale) @ (x_b @ Wk)^T @ x_b.

    x_ref : (1, Sp, Dp)  per-batch resident input block (also used as the "value").
    wq_ref, wk_ref : (Dp, Dp) resident weights.
    o_ref : (1, tq, Dp)  output tile.
    k_ref : (Sp, Dp)     VMEM scratch holding x_b @ Wk for the current batch.
    """
    qi = pl.program_id(1)

    @pl.when(qi == 0)
    def _():
        # Project K once per batch; stays VMEM-resident across all q-tiles.
        k = jnp.dot(x_ref[0], wk_ref[...], preferred_element_type=jnp.float32)
        k_ref[...] = k.astype(k_ref.dtype)

    row0 = pl.multiple_of(qi * tq, tq)
    xq = x_ref[0, pl.ds(row0, tq), :]                              # (tq, Dp)

    # Fold 1/sqrt(D^3) into q here (f32, on (tq, Dp)) instead of the (tq, Sp)
    # scores: S/D-times fewer VPU ops, applied before any bf16 cast.
    q = jnp.dot(xq, wq_ref[...], preferred_element_type=jnp.float32)
    q = (q * scale).astype(cdt)

    # Contract on the last dim of both operands -> no explicit k.T / XLU pass.
    scores = lax.dot_general(q, k_ref[...], (((1,), (1,)), ((), ())),
                             preferred_element_type=jnp.float32)   # (tq, Sp)

    out = jnp.dot(scores.astype(cdt), x_ref[0],
                  preferred_element_type=jnp.float32)              # (tq, Dp)
    o_ref[0] = out.astype(o_ref.dtype)


def self_attention(x, wq, wk, wv=None, attention_mask=None, *,
                   compute_dtype=None, max_q_tile=256):
    """Pallas port of SelfAttention.forward (the returned tensor only).

    x: (B, S, D). Returns (B, S, D) = ((x@Wq) @ (x@Wk)^T / sqrt(D^3)) @ x.
    compute_dtype: MXU operand dtype (e.g. jnp.bfloat16); accumulation is f32.
    """
    # TODO(synk): Wv, the -1000 mask-fill loops and softmax_tensor (undefined in
    # the PyTorch reference) never affect the returned tensor; omitted on purpose.
    del wv, attention_mask

    B, S, D = x.shape
    out_dtype = x.dtype
    cdt = jnp.dtype(compute_dtype) if compute_dtype is not None else jnp.dtype(x.dtype)
    scale = 1.0 / math.sqrt(float(D) ** 3)

    itemsize = cdt.itemsize
    out_itemsize = jnp.dtype(out_dtype).itemsize

    # ---- Alignment: last dim -> 128 lanes; second-minor -> dtype sublane pack. ----
    sub = max(8, 32 // itemsize)                 # f32: 8, bf16: 16, int8/fp8: 32
    D_pad = _round_up(D, 128)
    mqt = max(_round_up(max_q_tile, sub), sub)
    S_sub = _round_up(S, sub)
    tq = _pick_tile(S_sub, mqt, sub)
    if S_sub > mqt and tq < 128:
        # Awkward S: pad further so we can use a full-size, MXU-friendly q tile.
        tq = mqt
        S_pad = _round_up(S, tq)
    else:
        S_pad = S_sub

    pad_s = S_pad - S
    pad_d = D_pad - D
    xc = x.astype(cdt)
    wqc = wq.astype(cdt)
    wkc = wk.astype(cdt)
    if pad_s or pad_d:
        # Zero padding is exact for this kernel (no softmax in the output path).
        xc = jnp.pad(xc, ((0, 0), (0, pad_s), (0, pad_d)))
    if pad_d:
        wqc = jnp.pad(wqc, ((0, pad_d), (0, pad_d)))
        wkc = jnp.pad(wkc, ((0, pad_d), (0, pad_d)))

    # ---- VMEM budget (per-batch residency) + generation-aware limit. ------------
    # TODO(synk): for S*D residency beyond the VMEM budget (e.g. very long
    # sequences on v7x's 64 MiB), add a ki-streamed fallback variant.
    needed = int(
        2 * S_pad * D_pad * itemsize             # x block, double-buffered
        + 4 * D_pad * D_pad * itemsize           # Wq + Wk blocks (2 buffers each)
        + 2 * tq * D_pad * out_itemsize          # out tile, double-buffered
        + S_pad * D_pad * itemsize               # resident K scratch
        + 4 * (tq * S_pad + 2 * tq * D_pad + S_pad * D_pad)  # f32 temporaries
    )
    try:
        vmem_phys = int(pltpu.get_tpu_info().vmem_capacity_bytes)
    except Exception:
        vmem_phys = 64 * 1024 * 1024             # conservative (v7x per-TC)
    vmem_limit = max(32 * 1024 * 1024, min(needed * 3 // 2, vmem_phys * 3 // 4))

    flops = int(4 * B * S_pad * D_pad * D_pad + 4 * B * S_pad * S_pad * D_pad)
    bytes_accessed = int(B * S_pad * D_pad * itemsize
                         + 2 * D_pad * D_pad * itemsize
                         + B * S_pad * D_pad * out_itemsize)

    out = pl.pallas_call(
        functools.partial(_fused_attn_kernel, scale=scale, tq=tq, cdt=cdt),
        out_shape=jax.ShapeDtypeStruct((B, S_pad, D_pad), out_dtype),
        grid_spec=pltpu.PrefetchScalarGridSpec(
            num_scalar_prefetch=0,
            grid=(B, S_pad // tq),
            in_specs=[
                # x[b] resident across all q-tiles of this batch (no re-streaming).
                pl.BlockSpec((1, S_pad, D_pad), lambda b, qi: (b, 0, 0)),
                pl.BlockSpec((D_pad, D_pad), lambda b, qi: (0, 0)),   # Wq resident
                pl.BlockSpec((D_pad, D_pad), lambda b, qi: (0, 0)),   # Wk resident
            ],
            out_specs=pl.BlockSpec((1, tq, D_pad), lambda b, qi: (b, qi, 0)),
            scratch_shapes=[pltpu.VMEM((S_pad, D_pad), cdt)],          # K cache
        ),
        compiler_params=pltpu.CompilerParams(
            # B parallel for megacore; q-tile axis is "arbitrary" because the
            # per-batch K scratch (written at qi == 0) carries across q-tiles.
            dimension_semantics=("parallel", "arbitrary"),
            vmem_limit_bytes=int(vmem_limit),
        ),
        cost_estimate=pl.CostEstimate(
            flops=flops, transcendentals=0, bytes_accessed=bytes_accessed),
    )(xc, wqc, wkc)

    if pad_s or pad_d:
        out = out[:, :S, :D]
    return out


def _reference(x, wq, wk, compute_dtype=None):
    """Pure-JAX reference with the same dtype handling as the kernel path."""
    D = x.shape[-1]
    cdt = compute_dtype if compute_dtype is not None else x.dtype
    scale = 1.0 / math.sqrt(float(D) ** 3)
    xc = x.astype(cdt)
    q = jnp.einsum("bsd,de->bse", xc, wq.astype(cdt),
                   preferred_element_type=jnp.float32) * scale
    k = jnp.einsum("bsd,de->bse", xc, wk.astype(cdt),
                   preferred_element_type=jnp.float32)
    scores = jnp.einsum("bqd,bkd->bqk", q.astype(cdt), k.astype(cdt),
                        preferred_element_type=jnp.float32)
    out = jnp.einsum("bqk,bkd->bqd", scores.astype(cdt), xc,
                     preferred_element_type=jnp.float32)
    return out.astype(x.dtype)


if __name__ == "__main__":
    B, S, D = 2, 8, 32  # batch, seq_len, d_model

    key = jax.random.PRNGKey(0)
    kx, kq, kk, kv = jax.random.split(key, 4)

    x = jax.random.normal(kx, (B, S, D), dtype=jnp.float32)
    # Parameters ~ torch.randn((d_model, d_model)), initialized deterministically here.
    Wq = jax.random.normal(kq, (D, D), dtype=jnp.float32)
    Wk = jax.random.normal(kk, (D, D), dtype=jnp.float32)
    Wv = jax.random.normal(kv, (D, D), dtype=jnp.float32)     # dead in forward's output
    attention_mask = jnp.array([S, S // 2], dtype=jnp.int32)  # unused by output

    # f32 path: matches the exact reference tightly.
    out_f32 = jax.block_until_ready(self_attention(x, Wq, Wk, Wv, attention_mask))
    ref_f32 = _reference(x, Wq, Wk)
    assert out_f32.shape == (B, S, D)
    assert jnp.allclose(out_f32, ref_f32, atol=1e-4, rtol=1e-4), "f32 mismatch vs reference"

    # bf16-MXU path (f32 accumulation): compare against a bf16-consistent reference.
    out_bf16 = jax.block_until_ready(
        self_attention(x, Wq, Wk, Wv, attention_mask, compute_dtype=jnp.bfloat16))
    ref_bf16 = _reference(x, Wq, Wk, compute_dtype=jnp.bfloat16)
    assert out_bf16.shape == (B, S, D)
    assert jnp.allclose(out_bf16, ref_bf16, atol=1e-2, rtol=1e-2), "bf16 mismatch vs reference"

    print("KERNEL_OK")
</pallas_src>

<mosaic_0001>
module attributes {stable_mosaic.version = 11 : i64} {
  func.func @_fused_attn_kernel(%arg0: i32, %arg1: i32, %arg2: memref<1x8x128xf32, #tpu.memory_space<vmem>>, %arg3: memref<128x128xf32, #tpu.memory_space<vmem>>, %arg4: memref<128x128xf32, #tpu.memory_space<vmem>>, %arg5: memref<1x8x128xf32, #tpu.memory_space<vmem>>, %arg6: memref<8x128xf32, #tpu.memory_space<vmem>>) attributes {dimension_semantics = [#tpu.dimension_semantics<parallel>, #tpu.dimension_semantics<arbitrary>], iteration_bounds = array<i64: 2, 1>, scalar_prefetch = 0 : i64, scratch_operands = 1 : i64, tpu.core_type = #tpu.core_type<tc>, window_params = [{transform_indices = @transform_0, window_bounds = array<i64: 1, 8, 128>}, {pipeline_mode = #tpu.pipeline_mode<synchronous>, transform_indices = @transform_1, window_bounds = array<i64: 128, 128>}, {pipeline_mode = #tpu.pipeline_mode<synchronous>, transform_indices = @transform_2, window_bounds = array<i64: 128, 128>}, {transform_indices = @transform_3, window_bounds = array<i64: 1, 8, 128>}]} {
    %c0_i32 = arith.constant 0 : i32
    %0 = arith.cmpi eq, %arg1, %c0_i32 : i32
    %1 = arith.extui %0 : i1 to i32
    %c0_i32_0 = arith.constant 0 : i32
    %2 = arith.cmpi ne, %1, %c0_i32_0 : i32
    scf.if %2 {
      %c0_15 = arith.constant 0 : index
      %c0_16 = arith.constant 0 : index
      %c0_17 = arith.constant 0 : index
      %20 = vector.load %arg2[%c0_15, %c0_16, %c0_17] : memref<1x8x128xf32, #tpu.memory_space<vmem>>, vector<1x8x128xf32>
      %21 = vector.shape_cast %20 : vector<1x8x128xf32> to vector<8x128xf32>
      %c0_18 = arith.constant 0 : index
      %c0_19 = arith.constant 0 : index
      %22 = vector.load %arg4[%c0_18, %c0_19] : memref<128x128xf32, #tpu.memory_space<vmem>>, vector<128x128xf32>
      %cst_20 = arith.constant dense<0.000000e+00> : vector<8x128xf32>
      %23 = tpu.matmul %21, %22, %cst_20 {dimension_numbers = #tpu.dot_dimension_numbers<[1], [0], [0], [1], [0, 0, 1, 1], [], []>} : vector<8x128xf32>, vector<128x128xf32>, vector<8x128xf32> -> vector<8x128xf32>
      %c0_21 = arith.constant 0 : index
      %c0_22 = arith.constant 0 : index
      %24 = vector.load %arg6[%c0_21, %c0_22] : memref<8x128xf32, #tpu.memory_space<vmem>>, vector<8x128xf32>
      tpu.vector_store %arg6[%c0_21, %c0_22], %23 {strides = array<i32>} : memref<8x128xf32, #tpu.memory_space<vmem>>, vector<8x128xf32>,
    } else {
    }
    %c8_i32 = arith.constant 8 : i32
    %3 = arith.muli %arg1, %c8_i32 : i32
    %4 = tpu.assume_multiple %3, 8 : i32
    %c0 = arith.constant 0 : index
    %5 = arith.index_cast %4 : i32 to index
    %c0_1 = arith.constant 0 : index
    %6 = vector.load %arg2[%c0, %5, %c0_1] : memref<1x8x128xf32, #tpu.memory_space<vmem>>, vector<1x8x128xf32>
    %7 = vector.shape_cast %6 : vector<1x8x128xf32> to vector<8x128xf32>
    %c0_2 = arith.constant 0 : index
    %c0_3 = arith.constant 0 : index
    %8 = vector.load %arg3[%c0_2, %c0_3] : memref<128x128xf32, #tpu.memory_space<vmem>>, vector<128x128xf32>
    %cst = arith.constant dense<0.000000e+00> : vector<8x128xf32>
    %9 = tpu.matmul %7, %8, %cst {dimension_numbers = #tpu.dot_dimension_numbers<[1], [0], [0], [1], [0, 0, 1, 1], [], []>} : vector<8x128xf32>, vector<128x128xf32>, vector<8x128xf32> -> vector<8x128xf32>
    %cst_4 = arith.constant 0.00552427163 : f32
    %10 = vector.broadcast %cst_4 : f32 to vector<8x128xf32>
    %11 = arith.mulf %9, %10 : vector<8x128xf32>
    %c0_5 = arith.constant 0 : index
    %c0_6 = arith.constant 0 : index
    %12 = vector.load %arg6[%c0_5, %c0_6] : memref<8x128xf32, #tpu.memory_space<vmem>>, vector<8x128xf32>
    %cst_7 = arith.constant dense<0.000000e+00> : vector<8x8xf32>
    %13 = tpu.matmul %11, %12, %cst_7 {dimension_numbers = #tpu.dot_dimension_numbers<[1], [1], [0], [0], [0, 0, 1, 0], [], []>} : vector<8x128xf32>, vector<8x128xf32>, vector<8x8xf32> -> vector<8x8xf32>
    %c0_8 = arith.constant 0 : index
    %c0_9 = arith.constant 0 : index
    %c0_10 = arith.constant 0 : index
    %14 = vector.load %arg2[%c0_8, %c0_9, %c0_10] : memref<1x8x128xf32, #tpu.memory_space<vmem>>, vector<1x8x128xf32>
    %15 = vector.shape_cast %14 : vector<1x8x128xf32> to vector<8x128xf32>
    %cst_11 = arith.constant dense<0.000000e+00> : vector<8x128xf32>
    %16 = tpu.matmul %13, %15, %cst_11 {dimension_numbers = #tpu.dot_dimension_numbers<[1], [0], [0], [1], [0, 0, 1, 1], [], []>} : vector<8x8xf32>, vector<8x128xf32>, vector<8x128xf32> -> vector<8x128xf32>
    %c0_12 = arith.constant 0 : index
    %c0_13 = arith.constant 0 : index
    %c0_14 = arith.constant 0 : index
    %17 = vector.load %arg5[%c0_12, %c0_13, %c0_14] : memref<1x8x128xf32, #tpu.memory_space<vmem>>, vector<1x8x128xf32>
    %18 = vector.shape_cast %17 : vector<1x8x128xf32> to vector<8x128xf32>
    %19 = vector.shape_cast %16 : vector<8x128xf32> to vector<1x8x128xf32>
    tpu.vector_store %arg5[%c0_12, %c0_13, %c0_14], %19 {strides = array<i32>} : memref<1x8x128xf32, #tpu.memory_space<vmem>>, vector<1x8x128xf32>,
    return
  }
  func.func @transform_0(%arg0: i32, %arg1: i32) -> (i32, i32, i32) {
    %c0_i32 = arith.constant 0 : i32
    %c0_i32_0 = arith.constant 0 : i32
    %c0_i32_1 = arith.constant 0 : i32
    return %arg0, %c0_i32, %c0_i32_0 : i32, i32, i32
  }
  func.func @transform_1(%arg0: i32, %arg1: i32) -> (i32, i32) {
    %c0_i32 = arith.constant 0 : i32
    %c0_i32_0 = arith.constant 0 : i32
    %c0_i32_1 = arith.constant 0 : i32
    return %c0_i32, %c0_i32_0 : i32, i32
  }
  func.func @transform_2(%arg0: i32, %arg1: i32) -> (i32, i32) {
    %c0_i32 = arith.constant 0 : i32
    %c0_i32_0 = arith.constant 0 : i32
    %c0_i32_1 = arith.constant 0 : i32
    return %c0_i32, %c0_i32_0 : i32, i32
  }
  func.func @transform_3(%arg0: i32, %arg1: i32) -> (i32, i32, i32) {
    %c0_i32 = arith.constant 0 : i32
    %c0_i32_0 = arith.constant 0 : i32
    return %arg0, %arg1, %c0_i32 : i32, i32, i32
  }
}

</mosaic_0001>

<bundles_post_ra>
// kernel: tpu_custom_call.1
= control target key start
LH: loop header
LB: loop body
LE: loop exit
PB: predicated region body
PF: predicated region fallthrough
CT: control target
= control target key end

     0   :  { %8 = vsyncpa [#allocation4], 0  ;;  %s1325_s0 = inlined_call_operand.hbm [shape: f32[2,8,128], index: 0, kind: input, shape index: {}]   ;;  %s1326_s1 = inlined_call_operand.hbm [shape: f32[128,128], index: 1, kind: input, shape index: {}]   ;;  %s1327_s2 = inlined_call_operand.hbm [shape: f32[128,128], index: 2, kind: input, shape index: {}]   ;;  %s1328_s3 = inlined_call_operand.hbm [shape: f32[2,8,128], index: 3, kind: output, shape index: {}]  }
   0x1   :  { %10 = vsyncpa [#allocation4 + $0x1], 0 }
   0x2   :  { %11 = vsyncpa [#allocation7], 0 }
   0x3   :  { %12 = vsyncpa [#allocation5], 0 }
   0x4   :  { %14 = vsyncpa [#allocation5 + $0x1], 0  ;;  %s1090_s12 = smov 0   ;;  %s1092_s13 = smov 0  }
   0x5   :  { %s1094_s14 = smov 0   ;;  %s1096_s15 = smov 0  }
   0x6   :  { %s1098_s16 = smov 0   ;;  %s1100_s17 = smov 0  }
   0x7 LB: > { %s673_s18 = sadd.s32 4294967295, %s1060_s17   ;;  %s674_s19 = sadd.s32 4294967294, %s1060_s17   ;;  %s1060_s17 = sphi %s1100_s17, %s20_s17   ;;  %s1056_s16 = sphi %s1098_s16, %s1348_s16   ;;  %s1052_s15 = sphi %s1096_s15, %s1347_s15   ;;  %s1048_s14 = sphi %s1094_s14, %s1346_s14   ;;  %s1044_s13 = sphi %s1092_s13, %s1345_s13   ;;  %s1040_s12 = sphi %s1090_s12, %s1344_s12  }
   0x8   : > { %p52_p0 = scmp.ne.s32.totalorder %s1044_s13, %s1040_s12  ;;  %p1124_p1 = scmp.eq.s32.totalorder %s673_s18, 0 }
   0x9   : > { %p1128_p2 = scmp.eq.s32.totalorder %s673_s18, 1  ;;  %p126_p3 = scmp.eq.s32.totalorder %s674_s19, 1 }
   0xa   : > { %s1332_s20 = scalar_select %p1124_p1, 1, 0 }
   0xb   : > { %p1134_p4 = por %p1124_p1, %p52_p0  ;;  %p675_p5 = scmp.ge.s32.totalorder %s1060_s17, 1 }
   0xc   : > { %p1139_p6 = por %p126_p3, %p52_p0  ;;  %p133_p7 = scmp.lt.s32.totalorder %s1060_s17, 3 }
   0xd   : > { %s1334_s22 = scalar_select %p1134_p4, 1, 0 }
   0xe   : > { %s1335_s23 = scalar_select %p1139_p6, 1, 0 }
   0xf   : > { %p1144_p8 = pnand %p675_p5, %p133_p7  ;;  %s1062_s25 = smov [#allocation6]  }
  0x10   : > { %s145_s26 = sshll.u32 %s1062_s25, 4  ;;  %s1063_s28 = smov [#allocation8]   ;;  %s146_s26 = int_to_ptr.vmem [resolvable:$true] %s145_s26 }
  0x11   : > { %p821_p9 = pneg %p1144_p8  ;;  %s158_s29 = sshll.u32 %s1063_s28, 4  ;;  %s159_s29 = int_to_ptr.vmem [resolvable:$true] %s158_s29 }
  0x12   : > { %s907_s30 = scalar_lea.vmem %s146_s26, 2048  ;;  %p915_p5 = scmp.lt.s32.totalorder %s146_s26, %s146_s26 }
  0x13   : > { %p1153_p11 = pnand %p821_p9, %p1124_p1  ;;  %p908_p13 = scmp.ne.s32.totalorder %s146_s26, %s907_s30 }
  0x14   : > { %p916_p7 = scmp.lt.s32.totalorder %s907_s30, %s907_s30 }
  0x15   : > { %p898_p12 = pneg %p1153_p11 }
  0x16   : > { %p917_p10 = por %p916_p7, %p915_p5 }
  0x17   : > { %p910_p0 = pnand %p908_p13, %p898_p12 }
  0x19   : > { %p911_p3 = pneg %p910_p0 }
  0x1b   : > { %p918_p9 = pnand %p917_p10, %p911_p3 }
  0x1d   : > { %921 = shalt.err (!%p918_p9)
}
  0x1e   : > { %s1064_s4 = smov 128   ;;  %s1065_s5 = smov 8  }
  0x1f   : > { %824 = dma.hbm_to_vmem [thread:$0]  (!%p1153_p11), %s1326_s1, 2048, %s146_s26, [#allocation7], %s1064_s4, %s1064_s4, %s1065_s5  }
  0x20   : > { %s933_s8 = scalar_lea.vmem %s159_s29, 2048  ;;  %p941_p1 = scmp.lt.s32.totalorder %s159_s29, %s159_s29 }
  0x21   : > { %p934_p6 = scmp.ne.s32.totalorder %s159_s29, %s933_s8  ;;  %p942_p4 = scmp.lt.s32.totalorder %s933_s8, %s933_s8 }
  0x23   : > { %p936_p13 = pnand %p934_p6, %p898_p12  ;;  %p943_p5 = por %p942_p4, %p941_p1 }
  0x25   : > { %p937_p0 = pneg %p936_p13 }
  0x27   : > { %p944_p10 = pnand %p943_p5, %p937_p0 }
  0x29   : > { %947 = shalt.err (!%p944_p10)
}
  0x2a   : > { %827 = dma.hbm_to_vmem [thread:$0]  (!%p1153_p11), %s1327_s2, 2048, %s159_s29, [#allocation7], %s1064_s4, %s1064_s4, %s1065_s5  }
  0x2b   : > { %s32_s11 = sadd.s32 1, %s1056_s16  ;;  %s39_s18 = sadd.s32 1, %s1048_s14 }
  0x2c   : > { %p34_p1 = scmp.ge.s32.totalorder %s32_s11, 2  ;;  %p46_p4 = scmp.ne.s32.totalorder %s1048_s14, %s1044_s13 }
  0x2d   : > { %p47_p6 = scmp.eq.s32.totalorder %s1060_s17, 0  ;;  %p838_p12 = scmp.lt.s32.totalorder %s1060_s17, 2 }
  0x2e   : > { %s1350_s11 = smov (%p34_p1, %s32_s11), 0  ;;  %p1185_p7 = por %p1128_p2, %p46_p4 }
  0x2f   : > { %p48_p3 = por %p47_p6, %p46_p4  ;;  %s36_s25 = ssub.s32 %s1056_s16, %s1350_s11 }
  0x30   : > { %s172_s26 = sand.u32 1, %s1048_s14   ;;  %p37_p9 = scmp.eq.s32.totalorder %s36_s25, 0 }
  0x31   : > { %s679_s27 = sshll.u32 %s172_s26, 3  ;;  %s680_s28 = sshll.u32 %s1056_s16, 7 }
  0x32   : > { %s1194_s29 = scalar_select %p37_p9, %s1048_s14, %s39_s18  }
  0x33   : > { %s181_s5 = scalar_lea.hbm %s1325_s0, %s680_s28  ;;  %s176_s6 = scalar_lea.vmem [#allocation3], %s679_s27 }
  0x34   : > { %s183_s7 = sshll.u32 %s176_s6, 4  ;;  %p1201_p11 = pnand %p838_p12, %p48_p3  ;;  %s184_s7 = int_to_ptr.vmem [resolvable:$true] %s183_s7 }
  0x35   : > { %s173_s8 = scalar_lea.sflag [#allocation4], %s172_s26  ;;  %s961_s9 = scalar_lea.vmem %s184_s7, 128 }
  0x36   : > { %p950_p2 = pneg %p1201_p11  ;;  %p962_p13 = scmp.ne.s32.totalorder %s184_s7, %s961_s9 }
  0x37   : > { %s1066_s10 = smov [#allocation3]  }
  0x38   : > { %p964_p0 = pnand %p962_p13, %p950_p2  ;;  %s966_s18 = sshll.u32 %s1066_s10, 4  ;;  %s967_s18 = int_to_ptr.vmem [resolvable:$false] %s966_s18 }
  0x39   : > { %s968_s25 = scalar_lea.vmem %s967_s18, 256  ;;  %p969_p10 = scmp.lt.s32.totalorder %s184_s7, %s967_s18 }
  0x3a   : > { %p965_p5 = pneg %p964_p0  ;;  %p970_p1 = scmp.lt.s32.totalorder %s968_s25, %s961_s9 }
  0x3c   : > { %p971_p4 = por %p970_p1, %p969_p10 }
  0x3e   : > { %p972_p6 = pnand %p971_p4, %p965_p5 }
  0x40   : > { %975 = shalt.err (!%p972_p6)
}
  0x41   : > { %831 = dma.hbm_to_vmem [thread:$0]  (!%p1201_p11), %s181_s5, 128, %s184_s7, %s173_s8  }
  0x42   : > { %192 = sbr.rel (%p1144_p8) target bundleno = 705 (0x2c1), region = 32  ;;  %s1212_s26 = sand.u32 (!%p1144_p8), 1, %s1044_s13  }
  0x43   : > { %s682_s27 = sshll.u32 (!%p1144_p8), %s1212_s26, 3  ;;  %s195_s28 = scalar_lea.sflag (!%p1144_p8), [#allocation4], %s1212_s26 }
  0x44   : > { %s1218_s30 = scalar_lea.vmem (!%p1144_p8), [#allocation3], %s682_s27  ;;  %p1340_p12 = scmp.ne.s32.totalorder (!%p1144_p8), %s1334_s22, 0 }
  0x47   : > { %1027 = dma.done.wait (%p1340_p12), %s195_s28, 128  }
  0x48   : > { %1029 = vsyncadd (%p1340_p12), %s195_s28, 4294967168  ;;  %p1341_p3 = scmp.ne.s32.totalorder %s1332_s20, 0 }
  0x4a   : > { %1031 = dma.done.wait (%p1341_p3), [#allocation7], 4096  }
  0x4b   : > { %1033 = vsyncadd (%p1341_p3), [#allocation7], 4294963200  ;;  %v1067_v0 = vmov 0.0   ;;  %vm1068_vm0 = vmmov 0   ;;  %v249_v1 = vld [vmem:[#allocation8 + $0x78] sm:$0xff]  ;;  %v248_v3 = vld [vmem:[#allocation8 + $0x70] sm:$0xff] }
  0x4c   : > { %729 = vmatprep.subr.mxu0 %v1067_v0  ;;  %764 = vmatprep.subr.mxu1 %v1067_v0  ;;  %v339_v2 = vld [vmem:[#allocation6 + $0x78] sm:$0xff]  ;;  %v338_v4 = vld [vmem:[#allocation6 + $0x70] sm:$0xff]  ;;  %v247_v5 = vld [vmem:[#allocation8 + $0x68] sm:$0xff]  ;;  %vm483_vm1 = vcmask 64512   ;;  %s228_s20 = scalar_lea.vmem [#allocation9], %s682_s27  ;;  %s688_s24 = sshll.u32 %s1052_s15, 7 }
  0x4d   : > { %761 = vmatprep.mubr.msk.f32.mxu0 %vm1068_vm0, %v1067_v0  ;;  %796 = vmatprep.mubr.msk.f32.mxu1 %vm1068_vm0, %v1067_v0  ;;  %v337_v6 = vld [vmem:[#allocation6 + $0x68] sm:$0xff]  ;;  %v246_v7 = vld [vmem:[#allocation8 + $0x60] sm:$0xff]  ;;  %v245_v9 = vld [vmem:[#allocation8 + $0x58] sm:$0xff]  ;;  %s573_s22 = sshll.u32 %s228_s20, 4  ;;  %s1279_s6 = scalar_lea.hbm %s1328_s3, %s688_s24  ;;  %s1274_s22 = int_to_ptr.vmem [resolvable:$true] %s573_s22 }
  0x4e   : > { %730 = vmatpush3.msra.mxu0 %v249_v1  ;;  %765 = vmatpush3.msra.mxu1 %v339_v2  ;;  %v336_v8 = vld [vmem:[#allocation6 + $0x60] sm:$0xff]  ;;  %v335_v10 = vld [vmem:[#allocation6 + $0x58] sm:$0xff]  ;;  %v244_v11 = vld [vmem:[#allocation8 + $0x50] sm:$0xff]  ;;  %s559_s7 = scalar_lea.sflag [#allocation5], %s1212_s26  ;;  %s976_s21 = scalar_lea.vmem %s1274_s22, 128 }
  0x4f   : > { %731 = vmatprep.subr.mxu0 %v1067_v0  ;;  %766 = vmatprep.subr.mxu1 %v1067_v0  ;;  %v334_v12 = vld [vmem:[#allocation6 + $0x50] sm:$0xff]  ;;  %v243_v13 = vld [vmem:[#allocation8 + $0x48] sm:$0xff]  ;;  %v242_v15 = vld [vmem:[#allocation8 + $0x40] sm:$0xff]  ;;  %p977_p8 = scmp.ne.s32.totalorder %s1274_s22, %s976_s21  ;;  %s1069_s15 = smov [#allocation9]  }
  0x50   : > { %732 = vmatpush3.msra.mxu0 %v248_v3  ;;  %767 = vmatpush3.msra.mxu1 %v338_v4  ;;  %v333_v14 = vld [vmem:[#allocation6 + $0x48] sm:$0xff]  ;;  %v332_v16 = vld [vmem:[#allocation6 + $0x40] sm:$0xff]  ;;  %v241_v17 = vld [vmem:[#allocation8 + $0x38] sm:$0xff]  ;;  %s980_s8 = sshll.u32 %s1069_s15, 4  ;;  %s981_s8 = int_to_ptr.vmem [resolvable:$false] %s980_s8 }
  0x51   : > { %733 = vmatprep.subr.mxu0 %v1067_v0  ;;  %768 = vmatprep.subr.mxu1 %v1067_v0  ;;  %v331_v18 = vld [vmem:[#allocation6 + $0x38] sm:$0xff]  ;;  %v240_v19 = vld [vmem:[#allocation8 + $0x30] sm:$0xff]  ;;  %v239_v21 = vld [vmem:[#allocation8 + $0x28] sm:$0xff]  ;;  %p978_p9 = pnand %p977_p8, %p1185_p7  ;;  %s982_s9 = scalar_lea.vmem %s981_s8, 256 }
  0x52   : > { %734 = vmatpush3.msra.mxu0 %v247_v5  ;;  %769 = vmatpush3.msra.mxu1 %v337_v6  ;;  %v330_v20 = vld [vmem:[#allocation6 + $0x30] sm:$0xff]  ;;  %v329_v22 = vld [vmem:[#allocation6 + $0x28] sm:$0xff]  ;;  %v238_v23 = vld [vmem:[#allocation8 + $0x20] sm:$0xff]  ;;  %p983_p2 = scmp.lt.s32.totalorder %s1274_s22, %s981_s8  ;;  %p984_p13 = scmp.lt.s32.totalorder %s982_s9, %s976_s21 }
  0x53   : > { %735 = vmatprep.subr.mxu0 %v1067_v0  ;;  %770 = vmatprep.subr.mxu1 %v1067_v0  ;;  %v328_v24 = vld [vmem:[#allocation6 + $0x20] sm:$0xff]  ;;  %v237_v25 = vld [vmem:[#allocation8 + $0x18] sm:$0xff]  ;;  %v236_v27 = vld [vmem:[#allocation8 + $0x10] sm:$0xff]  ;;  %p979_p11 = pneg %p978_p9 }
  0x54   : > { %736 = vmatpush3.msra.mxu0 %v246_v7  ;;  %771 = vmatpush3.msra.mxu1 %v336_v8  ;;  %v327_v26 = vld [vmem:[#allocation6 + $0x18] sm:$0xff]  ;;  %v326_v28 = vld [vmem:[#allocation6 + $0x10] sm:$0xff]  ;;  %v235_v29 = vld [vmem:[#allocation8 + $0x8] sm:$0xff]  ;;  %p985_p0 = por %p984_p13, %p983_p2 }
  0x55   : > { %737 = vmatprep.subr.mxu0 %v1067_v0  ;;  %772 = vmatprep.subr.mxu1 %v1067_v0  ;;  %v325_v30 = vld [vmem:[#allocation6 + $0x8] sm:$0xff]  ;;  %v234_v31 = vld [vmem:[#allocation8] sm:$0xff]  ;;  %v233_v33 = vld [vmem:[%s1218_s30] sm:$0xff] }
  0x56   : > { %738 = vmatpush3.msra.mxu0 %v245_v9  ;;  %773 = vmatpush3.msra.mxu1 %v335_v10  ;;  %v324_v32 = vld [vmem:[#allocation6] sm:$0xff]  ;;  %p986_p5 = pnand %p985_p0, %p979_p11 }
  0x57   : > { %739 = vmatprep.subr.mxu0 %v1067_v0  ;;  %774 = vmatprep.subr.mxu1 %v1067_v0 }
  0x58   : > { %740 = vmatpush3.msra.mxu0 %v244_v11  ;;  %775 = vmatpush3.msra.mxu1 %v334_v12 }
  0x59   : > { %741 = vmatprep.subr.mxu0 %v1067_v0  ;;  %776 = vmatprep.subr.mxu1 %v1067_v0 }
  0x5a   : > { %742 = vmatpush3.msra.mxu0 %v243_v13  ;;  %777 = vmatpush3.msra.mxu1 %v333_v14 }
  0x5b   : > { %743 = vmatprep.subr.mxu0 %v1067_v0  ;;  %778 = vmatprep.subr.mxu1 %v1067_v0 }
  0x5c   : > { %744 = vmatpush3.msra.mxu0 %v242_v15  ;;  %779 = vmatpush3.msra.mxu1 %v332_v16 }
  0x5d   : > { %745 = vmatprep.subr.mxu0 %v1067_v0  ;;  %780 = vmatprep.subr.mxu1 %v1067_v0 }
  0x5e   : > { %746 = vmatpush3.msra.mxu0 %v241_v17  ;;  %781 = vmatpush3.msra.mxu1 %v331_v18 }
  0x5f   : > { %747 = vmatprep.subr.mxu0 %v1067_v0  ;;  %782 = vmatprep.subr.mxu1 %v1067_v0 }
  0x60   : > { %748 = vmatpush3.msra.mxu0 %v240_v19  ;;  %783 = vmatpush3.msra.mxu1 %v330_v20 }
  0x61   : > { %749 = vmatprep.subr.mxu0 %v1067_v0  ;;  %784 = vmatprep.subr.mxu1 %v1067_v0 }
  0x62   : > { %750 = vmatpush3.msra.mxu0 %v239_v21  ;;  %785 = vmatpush3.msra.mxu1 %v329_v22 }
  0x63   : > { %751 = vmatprep.subr.mxu0 %v1067_v0  ;;  %786 = vmatprep.subr.mxu1 %v1067_v0 }
  0x64   : > { %752 = vmatpush3.msra.mxu0 %v238_v23  ;;  %787 = vmatpush3.msra.mxu1 %v328_v24 }
  0x65   : > { %753 = vmatprep.subr.mxu0 %v1067_v0  ;;  %788 = vmatprep.subr.mxu1 %v1067_v0 }
  0x66   : > { %754 = vmatpush3.msra.mxu0 %v237_v25  ;;  %789 = vmatpush3.msra.mxu1 %v327_v26 }
  0x67   : > { %755 = vmatprep.subr.mxu0 %v1067_v0  ;;  %790 = vmatprep.subr.mxu1 %v1067_v0 }
  0x68   : > { %756 = vmatpush3.msra.mxu0 %v236_v27  ;;  %791 = vmatpush3.msra.mxu1 %v326_v28 }
  0x69   : > { %757 = vmatprep.subr.mxu0 %v1067_v0  ;;  %792 = vmatprep.subr.mxu1 %v1067_v0 }
  0x6a   : > { %758 = vmatpush3.msra.mxu0 %v235_v29  ;;  %793 = vmatpush3.msra.mxu1 %v325_v30 }
  0x6b   : > { %759 = vmatprep.subr.mxu0 %v1067_v0  ;;  %794 = vmatprep.subr.mxu1 %v1067_v0 }
  0x6c   : > { %760 = vmatpush3.msra.mxu0 %v234_v31  ;;  %795 = vmatpush3.msra.mxu1 %v324_v32 }
  0x6d   : > { %762 = vmatmul.mubr.f32.vlgmr.msra.gmra.mxu0 %v233_v33  ;;  %797 = vmatmul.mubr.f32.vlgmr.msra.gmra.mxu1 %v233_v33 }
  0x6e   : > { %799 = vmatprep.subr.mxu0 %v1067_v0  ;;  %801 = vmatprep.mubr.msk.f32.mxu0 %vm1068_vm0, %v1067_v0 }
  0x6f   : > { %804 = vmatprep.subr.mxu1 %v1067_v0  ;;  %806 = vmatprep.mubr.msk.f32.mxu1 %vm1068_vm0, %v1067_v0 }
  0x70   : > { %805 = vmatpush3.msra.mxu1 %v233_v33 }
 0x12d   : > { %v316_v34 = vpop.f32.mrf.mxu0  ;;  %v406_v35 = vpop.f32.mrf.mxu1 }
 0x12e   : > { %v410_v36 = vmul.f32 0.0055242716, %v406_v35  ;;  %800 = vmatpush3.xpose.msra.mxu0 %v316_v34 }
 0x12f   : > { %v763_v37 = vpop.f32.mrf.mxu0  ;;  %v798_v38 = vpop.f32.mrf.mxu1 }
 0x131   : > { %802 = vmatmul.mubr.f32.vlgmr.msra.gmra.mxu0 %v410_v36 }
 0x1f1   : > { %v478_v39 = vpop.f32.mrf.mxu0 }
 0x1f2   : > { %807 = vmatmul.mubr.msk.f32.vlgmr.msra.gmra.mxu1 %vm483_vm1, %v478_v39 }
 0x1f3   : > { %v803_v40 = vpop.f32.mrf.mxu0 }
 0x2b2   : > { %v553_v41 = vpop.f32.mrf.mxu1 }
 0x2b3   : > { %557 = vst [vmem:[%s228_s20] sm:$0xff] %v553_v41 }
 0x2b4   : > { %v808_v42 = vpop.f32.mrf.mxu1 }
 0x2b5   : > { %989 = shalt.err (!%p986_p5)
}
 0x2b6   : > { %s990_s10 = scalar_lea.hbm %s1279_s6, 128  ;;  %s994_s26 = scalar_lea.hbm %s1328_s3, 256 }
 0x2b7   : > { %p991_p10 = scmp.ne.s32.totalorder %s1279_s6, %s990_s10  ;;  %p995_p6 = scmp.lt.s32.totalorder %s1279_s6, %s1328_s3 }
 0x2b8   : > { %p996_p12 = scmp.lt.s32.totalorder %s994_s26, %s990_s10 }
 0x2b9   : > { %p992_p1 = pnand %p991_p10, %p1185_p7 }
 0x2ba   : > { %p997_p3 = por %p996_p12, %p995_p6 }
 0x2bb   : > { %p993_p4 = pneg %p992_p1 }
 0x2bd   : > { %p998_p8 = pnand %p997_p3, %p993_p4 }
 0x2bf   : > { %1001 = shalt.err (!%p998_p8)
}
 0x2c0   : > { %819 = dma.vmem_to_hbm [thread:$0]  (%p1185_p7), %s1274_s22, 128, %s1279_s6, %s559_s7  }
 0x2c1 PF: > { %s585_s30 = sand.u32 1, %s1040_s12   ;;  %p1342_p9 = scmp.ne.s32.totalorder %s1335_s23, 0 }
 0x2c2   : > { %p1343_p11 = scmp.ge.s32.totalorder %s1060_s17, 2  ;;  %s586_s20 = scalar_lea.sflag [#allocation5], %s585_s30 }
 0x2c4   : > { %p833_p2 = pnand %p1343_p11, %p1342_p9 }
 0x2c6   : > { %p834_p13 = pneg %p833_p2 }
 0x2c8   : > { %1035 = dma.done.wait (%p834_p13), %s586_s20, 128  }
 0x2c9   : > { %1037 = vsyncadd (%p834_p13), %s586_s20, 4294967168  ;;  %s20_s17 = sadd.s32 1, %s1060_s17   ;;  %s1344_s12 = smov %s1044_s13 }
 0x2ca   : > { %p17_p0 = scmp.ge.s32.totalorder %s20_s17, 4   ;;  %s1345_s13 = smov %s1048_s14 }
 0x2cb   : > { %s1346_s14 = smov %s1194_s29  ;;  %s1347_s15 = smov %s1056_s16 }
 0x2cc   : > { %s1348_s16 = smov %s1350_s11  ;;  %19 = sbr.rel (!%p17_p0) target bundleno = 7 (0x7), region = 90 }
 0x2d1   :  { %591 = vsyncpa [#allocation4], 1 }
 0x2d2   :  { %593 = vsyncpa [#allocation4 + $0x1], 1 }
 0x2d3   :  { %594 = vsyncpa [#allocation7], 1 }
 0x2d4   :  { %595 = vsyncpa [#allocation5], 1 }
 0x2d5   :  { %597 = vsyncpa [#allocation5 + $0x1], 1 }

</bundles_post_ra>
